<compile_context>
chip_gen: v7x
topology: tpu7x:2x2x1
jax: 0.10.0
libtpu: 0.0.40
codegen_flags: <defaults>
</compile_context>

<pallas_src>
import functools

import jax
import jax.numpy as jnp
from jax.experimental import pallas as pl
from jax.experimental.pallas import tpu as pltpu

LN_EPS = 1e-5            # torch.nn.LayerNorm default
H1, H2 = 128, 64         # hidden sizes from the module
ACT_PAD = 128            # lane-dense padded action dimension
TILE_CAP = 1024          # max rows per batch tile (review: 1024-2048 sweet spot)


def _round_up(x, m):
    return (x + m - 1) // m * m


def _layernorm_fused(x, gamma, beta):
    # Fused single pass: mean and E[x^2] are independent reductions (overlap
    # on the XLU), var = E[x^2] - mean^2 removes the reduce->sub->reduce chain.
    mean = jnp.mean(x, axis=-1, keepdims=True)
    msq = jnp.mean(x * x, axis=-1, keepdims=True)
    var = msq - mean * mean
    return (x - mean) * jax.lax.rsqrt(var + LN_EPS) * gamma + beta


def actor_kernel(x_ref, w1_ref, w2_ref, w3_ref, p_ref, out_ref):
    x = x_ref[...]                                   # [TB, state_dim] f32

    p = p_ref[...]                                   # [8, 128] f32 param slab
    b1, g1, be1, b3 = p[0:1], p[1:2], p[2:3], p[3:4]                 # 128-wide
    b2, g2, be2 = p[4:5, :H2], p[5:6, :H2], p[6:7, :H2]              # 64-wide

    # fc1 -> LayerNorm(128) -> ReLU   (bf16 MXU inputs, f32 accumulate)
    h = jnp.dot(x.astype(jnp.bfloat16), w1_ref[...],
                preferred_element_type=jnp.float32) + b1
    h = jnp.maximum(_layernorm_fused(h, g1, be1), 0.0)

    # fc2 -> LayerNorm(64) -> ReLU
    h = jnp.dot(h.astype(jnp.bfloat16), w2_ref[...],
                preferred_element_type=jnp.float32) + b2
    h = jnp.maximum(_layernorm_fused(h, g2, be2), 0.0)

    # mu (padded to 128 lanes) -> tanh; padded lanes are exactly 0 -> tanh 0.
    out_ref[...] = jnp.tanh(
        jnp.dot(h.astype(jnp.bfloat16), w3_ref[...],
                preferred_element_type=jnp.float32) + b3)


def prepare_params(params):
    """One-time packing (outside the jitted forward): bf16 weights + one
    [8,128] f32 slab holding b1,g1,be1,b3_pad,b2_pad,g2_pad,be2_pad,0."""
    action_dim = params["w3"].shape[1]

    w3p = jnp.zeros((H2, ACT_PAD), jnp.float32).at[:, :action_dim].set(params["w3"])
    b3p = jnp.zeros((1, ACT_PAD), jnp.float32).at[:, :action_dim].set(params["b3"])

    def pad128(v):
        return jnp.zeros((1, ACT_PAD), jnp.float32).at[:, : v.shape[1]].set(v)

    pslab = jnp.concatenate(
        [params["b1"], params["g1"], params["be1"], b3p,
         pad128(params["b2"]), pad128(params["g2"]), pad128(params["be2"]),
         jnp.zeros((1, ACT_PAD), jnp.float32)],
        axis=0)                                      # [8, 128]

    return {
        "w1": params["w1"].astype(jnp.bfloat16),     # [state_dim, 128]
        "w2": params["w2"].astype(jnp.bfloat16),     # [128, 64]
        "w3": w3p.astype(jnp.bfloat16),              # [64, 128] (zero-padded)
        "p": pslab,                                  # [8, 128] f32
    }


@functools.partial(jax.jit, static_argnames=("action_dim",))
def actor_forward(state, prepared, *, action_dim):
    """state: [B, state_dim] f32. prepared: output of prepare_params()."""
    B, state_dim = state.shape

    # Batch tiling: minimize pad waste, keep TB a multiple of 16 (bf16 sublane
    # packing), and force >=2 tiles when B is large so v7x megacore is used.
    n_tiles = pl.cdiv(B, TILE_CAP)
    if B >= 512 and n_tiles < 2:
        n_tiles = 2
    TB = _round_up(pl.cdiv(B, n_tiles), 16)
    Bp = n_tiles * TB
    xp = state if Bp == B else jnp.pad(state, ((0, Bp - B), (0, 0)))

    def resident(a):   # constant block index -> stays in VMEM across grid steps
        return pl.BlockSpec(a.shape, lambda i: (0, 0))

    w1, w2, w3, pslab = prepared["w1"], prepared["w2"], prepared["w3"], prepared["p"]

    flops = 2 * Bp * (state_dim * H1 + H1 * H2 + H2 * ACT_PAD)
    bytes_accessed = (4 * xp.size                      # f32 states in
                      + 2 * (w1.size + w2.size + w3.size)   # bf16 weights in
                      + 4 * pslab.size                 # f32 param slab in
                      + 4 * Bp * ACT_PAD)              # f32 output out
    transcendentals = Bp * (2 + ACT_PAD)               # 2 rsqrt/row + tanh/lane

    out = pl.pallas_call(
        actor_kernel,
        out_shape=jax.ShapeDtypeStruct((Bp, ACT_PAD), jnp.float32),
        grid=(n_tiles,),
        in_specs=[
            pl.BlockSpec((TB, state_dim), lambda i: (i, 0)),   # state tile
            resident(w1),                                      # [state_dim,128]
            resident(w2),                                      # [128, 64]
            resident(w3),                                      # [64, 128]
            resident(pslab),                                    # [8, 128]
        ],
        out_specs=pl.BlockSpec((TB, ACT_PAD), lambda i: (i, 0)),
        compiler_params=pltpu.CompilerParams(
            dimension_semantics=("parallel",)),
        cost_estimate=pl.CostEstimate(
            flops=flops,
            transcendentals=transcendentals,
            bytes_accessed=bytes_accessed),
    )(xp, w1, w2, w3, pslab)

    return out[:B, :action_dim]


def init_actor_params(key, state_dim, action_dim):
    """Deterministic init mimicking Actor.initialization() (uniform ranges)."""
    k = jax.random.split(key, 6)
    f1 = 1.0 / jnp.sqrt(jnp.float32(H1))   # torch: 1/sqrt(weight.size()[0]) = 1/sqrt(128)
    f2 = 1.0 / jnp.sqrt(jnp.float32(H2))
    f3 = 0.003

    def uni(kk, shape, lim):
        return jax.random.uniform(kk, shape, jnp.float32, -lim, lim)

    return {
        # weights stored as [in, out] (transposed vs torch's [out, in])
        "w1": uni(k[0], (state_dim, H1), f1),
        "b1": uni(k[1], (1, H1), f1),
        "g1": jnp.ones((1, H1), jnp.float32),    # LayerNorm weight
        "be1": jnp.zeros((1, H1), jnp.float32),  # LayerNorm bias
        "w2": uni(k[2], (H1, H2), f2),
        "b2": uni(k[3], (1, H2), f2),
        "g2": jnp.ones((1, H2), jnp.float32),
        "be2": jnp.zeros((1, H2), jnp.float32),
        "w3": uni(k[4], (H2, action_dim), f3),
        "b3": uni(k[5], (1, action_dim), f3),
    }


def actor_forward_ref(state, p):
    """Pure-JAX f32 reference for verification."""
    def ln(x, g, b):
        m = jnp.mean(x, axis=-1, keepdims=True)
        v = jnp.mean((x - m) ** 2, axis=-1, keepdims=True)
        return (x - m) / jnp.sqrt(v + LN_EPS) * g + b

    h = jnp.maximum(ln(state @ p["w1"] + p["b1"], p["g1"], p["be1"]), 0.0)
    h = jnp.maximum(ln(h @ p["w2"] + p["b2"], p["g2"], p["be2"]), 0.0)
    return jnp.tanh(h @ p["w3"] + p["b3"])


if __name__ == "__main__":
    key = jax.random.PRNGKey(0)
    k_param, k_state = jax.random.split(key)

    batch, state_dim, action_dim = 8, 12, 4
    params = init_actor_params(k_param, state_dim, action_dim)
    prepared = prepare_params(params)   # one-time bf16 cast + slab packing
    state = jax.random.normal(k_state, (batch, state_dim), jnp.float32)

    out = jax.block_until_ready(actor_forward(state, prepared, action_dim=action_dim))
    ref = actor_forward_ref(state, params)
    assert out.shape == (batch, action_dim)
    # bf16 MXU inputs with f32 accumulation vs a pure-f32 reference.
    assert jnp.allclose(out, ref, atol=1e-2, rtol=1e-2), "mismatch vs reference"

    # Ragged batch (exercises the batch-padding path).
    state5 = jax.random.normal(jax.random.PRNGKey(3), (5, state_dim), jnp.float32)
    out5 = jax.block_until_ready(actor_forward(state5, prepared, action_dim=action_dim))
    ref5 = actor_forward_ref(state5, params)
    assert out5.shape == (5, action_dim)
    assert jnp.allclose(out5, ref5, atol=1e-2, rtol=1e-2), "ragged mismatch"

    # Larger batch (exercises the multi-tile / megacore path: n_tiles >= 2).
    state_big = jax.random.normal(jax.random.PRNGKey(7), (600, state_dim), jnp.float32)
    out_big = jax.block_until_ready(
        actor_forward(state_big, prepared, action_dim=action_dim))
    ref_big = actor_forward_ref(state_big, params)
    assert out_big.shape == (600, action_dim)
    assert jnp.allclose(out_big, ref_big, atol=1e-2, rtol=1e-2), "big-batch mismatch"

    print("KERNEL_OK")
</pallas_src>

<mosaic_0001>
module attributes {stable_mosaic.version = 11 : i64} {
  func.func @actor_kernel(%arg0: i32, %arg1: memref<16x12xf32, #tpu.memory_space<vmem>>, %arg2: memref<12x128xbf16, #tpu.memory_space<vmem>>, %arg3: memref<128x64xbf16, #tpu.memory_space<vmem>>, %arg4: memref<64x128xbf16, #tpu.memory_space<vmem>>, %arg5: memref<8x128xf32, #tpu.memory_space<vmem>>, %arg6: memref<16x128xf32, #tpu.memory_space<vmem>>) attributes {dimension_semantics = [#tpu.dimension_semantics<parallel>], iteration_bounds = array<i64: 1>, scalar_prefetch = 0 : i64, scratch_operands = 0 : i64, tpu.core_type = #tpu.core_type<tc>, window_params = [{transform_indices = @transform_0, window_bounds = array<i64: 16, 12>}, {pipeline_mode = #tpu.pipeline_mode<synchronous>, transform_indices = @transform_1, window_bounds = array<i64: 12, 128>}, {pipeline_mode = #tpu.pipeline_mode<synchronous>, transform_indices = @transform_2, window_bounds = array<i64: 128, 64>}, {pipeline_mode = #tpu.pipeline_mode<synchronous>, transform_indices = @transform_3, window_bounds = array<i64: 64, 128>}, {pipeline_mode = #tpu.pipeline_mode<synchronous>, transform_indices = @transform_4, window_bounds = array<i64: 8, 128>}, {transform_indices = @transform_5, window_bounds = array<i64: 16, 128>}]} {
    %c0 = arith.constant 0 : index
    %c0_0 = arith.constant 0 : index
    %0 = vector.load %arg1[%c0, %c0_0] : memref<16x12xf32, #tpu.memory_space<vmem>>, vector<16x12xf32>
    %c0_1 = arith.constant 0 : index
    %c0_2 = arith.constant 0 : index
    %1 = vector.load %arg5[%c0_1, %c0_2] : memref<8x128xf32, #tpu.memory_space<vmem>>, vector<8x128xf32>
    %2 = vector.extract_strided_slice %1 {offsets = [0, 0], sizes = [1, 128], strides = [1, 1]} : vector<8x128xf32> to vector<1x128xf32>
    %3 = vector.extract_strided_slice %1 {offsets = [1, 0], sizes = [1, 128], strides = [1, 1]} : vector<8x128xf32> to vector<1x128xf32>
    %4 = vector.extract_strided_slice %1 {offsets = [2, 0], sizes = [1, 128], strides = [1, 1]} : vector<8x128xf32> to vector<1x128xf32>
    %5 = vector.extract_strided_slice %1 {offsets = [3, 0], sizes = [1, 128], strides = [1, 1]} : vector<8x128xf32> to vector<1x128xf32>
    %6 = vector.extract_strided_slice %1 {offsets = [4, 0], sizes = [1, 64], strides = [1, 1]} : vector<8x128xf32> to vector<1x64xf32>
    %7 = vector.extract_strided_slice %1 {offsets = [5, 0], sizes = [1, 64], strides = [1, 1]} : vector<8x128xf32> to vector<1x64xf32>
    %8 = vector.extract_strided_slice %1 {offsets = [6, 0], sizes = [1, 64], strides = [1, 1]} : vector<8x128xf32> to vector<1x64xf32>
    %9 = arith.truncf %0 : vector<16x12xf32> to vector<16x12xbf16>
    %c0_3 = arith.constant 0 : index
    %c0_4 = arith.constant 0 : index
    %10 = vector.load %arg2[%c0_3, %c0_4] : memref<12x128xbf16, #tpu.memory_space<vmem>>, vector<12x128xbf16>
    %cst = arith.constant dense<0.000000e+00> : vector<16x128xf32>
    %11 = tpu.matmul %9, %10, %cst {dimension_numbers = #tpu.dot_dimension_numbers<[1], [0], [0], [1], [0, 0, 1, 1], [], []>} : vector<16x12xbf16>, vector<12x128xbf16>, vector<16x128xf32> -> vector<16x128xf32>
    %12 = vector.broadcast %2 : vector<1x128xf32> to vector<16x128xf32>
    %13 = arith.addf %11, %12 : vector<16x128xf32>
    %cst_5 = arith.constant dense<0.000000e+00> : vector<16xf32>
    %14 = vector.multi_reduction <add>, %13, %cst_5 [1] : vector<16x128xf32> to vector<16xf32>
    %15 = vector.shape_cast %14 : vector<16xf32> to vector<16x1xf32>
    %cst_6 = arith.constant 1.280000e+02 : f32
    %16 = vector.broadcast %cst_6 : f32 to vector<16x1xf32>
    %17 = arith.divf %15, %16 : vector<16x1xf32>
    %18 = arith.mulf %13, %13 : vector<16x128xf32>
    %cst_7 = arith.constant dense<0.000000e+00> : vector<16xf32>
    %19 = vector.multi_reduction <add>, %18, %cst_7 [1] : vector<16x128xf32> to vector<16xf32>
    %20 = vector.shape_cast %19 : vector<16xf32> to vector<16x1xf32>
    %cst_8 = arith.constant 1.280000e+02 : f32
    %21 = vector.broadcast %cst_8 : f32 to vector<16x1xf32>
    %22 = arith.divf %20, %21 : vector<16x1xf32>
    %23 = arith.mulf %17, %17 : vector<16x1xf32>
    %24 = arith.subf %22, %23 : vector<16x1xf32>
    %25 = vector.broadcast %17 : vector<16x1xf32> to vector<16x128xf32>
    %26 = arith.subf %13, %25 : vector<16x128xf32>
    %cst_9 = arith.constant 9.99999974E-6 : f32
    %27 = vector.broadcast %cst_9 : f32 to vector<16x1xf32>
    %28 = arith.addf %24, %27 : vector<16x1xf32>
    %29 = math.rsqrt %28 : vector<16x1xf32>
    %30 = vector.broadcast %29 : vector<16x1xf32> to vector<16x128xf32>
    %31 = arith.mulf %26, %30 : vector<16x128xf32>
    %32 = vector.broadcast %3 : vector<1x128xf32> to vector<16x128xf32>
    %33 = arith.mulf %31, %32 : vector<16x128xf32>
    %34 = vector.broadcast %4 : vector<1x128xf32> to vector<16x128xf32>
    %35 = arith.addf %33, %34 : vector<16x128xf32>
    %cst_10 = arith.constant 0.000000e+00 : f32
    %36 = vector.broadcast %cst_10 : f32 to vector<16x128xf32>
    %37 = arith.maximumf %35, %36 : vector<16x128xf32>
    %38 = arith.truncf %37 : vector<16x128xf32> to vector<16x128xbf16>
    %c0_11 = arith.constant 0 : index
    %c0_12 = arith.constant 0 : index
    %39 = vector.load %arg3[%c0_11, %c0_12] : memref<128x64xbf16, #tpu.memory_space<vmem>>, vector<128x64xbf16>
    %cst_13 = arith.constant dense<0.000000e+00> : vector<16x64xf32>
    %40 = tpu.matmul %38, %39, %cst_13 {dimension_numbers = #tpu.dot_dimension_numbers<[1], [0], [0], [1], [0, 0, 1, 1], [], []>} : vector<16x128xbf16>, vector<128x64xbf16>, vector<16x64xf32> -> vector<16x64xf32>
    %41 = vector.broadcast %6 : vector<1x64xf32> to vector<16x64xf32>
    %42 = arith.addf %40, %41 : vector<16x64xf32>
    %cst_14 = arith.constant dense<0.000000e+00> : vector<16xf32>
    %43 = vector.multi_reduction <add>, %42, %cst_14 [1] : vector<16x64xf32> to vector<16xf32>
    %44 = vector.shape_cast %43 : vector<16xf32> to vector<16x1xf32>
    %cst_15 = arith.constant 6.400000e+01 : f32
    %45 = vector.broadcast %cst_15 : f32 to vector<16x1xf32>
    %46 = arith.divf %44, %45 : vector<16x1xf32>
    %47 = arith.mulf %42, %42 : vector<16x64xf32>
    %cst_16 = arith.constant dense<0.000000e+00> : vector<16xf32>
    %48 = vector.multi_reduction <add>, %47, %cst_16 [1] : vector<16x64xf32> to vector<16xf32>
    %49 = vector.shape_cast %48 : vector<16xf32> to vector<16x1xf32>
    %cst_17 = arith.constant 6.400000e+01 : f32
    %50 = vector.broadcast %cst_17 : f32 to vector<16x1xf32>
    %51 = arith.divf %49, %50 : vector<16x1xf32>
    %52 = arith.mulf %46, %46 : vector<16x1xf32>
    %53 = arith.subf %51, %52 : vector<16x1xf32>
    %54 = vector.broadcast %46 : vector<16x1xf32> to vector<16x64xf32>
    %55 = arith.subf %42, %54 : vector<16x64xf32>
    %cst_18 = arith.constant 9.99999974E-6 : f32
    %56 = vector.broadcast %cst_18 : f32 to vector<16x1xf32>
    %57 = arith.addf %53, %56 : vector<16x1xf32>
    %58 = math.rsqrt %57 : vector<16x1xf32>
    %59 = vector.broadcast %58 : vector<16x1xf32> to vector<16x64xf32>
    %60 = arith.mulf %55, %59 : vector<16x64xf32>
    %61 = vector.broadcast %7 : vector<1x64xf32> to vector<16x64xf32>
    %62 = arith.mulf %60, %61 : vector<16x64xf32>
    %63 = vector.broadcast %8 : vector<1x64xf32> to vector<16x64xf32>
    %64 = arith.addf %62, %63 : vector<16x64xf32>
    %cst_19 = arith.constant 0.000000e+00 : f32
    %65 = vector.broadcast %cst_19 : f32 to vector<16x64xf32>
    %66 = arith.maximumf %64, %65 : vector<16x64xf32>
    %67 = arith.truncf %66 : vector<16x64xf32> to vector<16x64xbf16>
    %c0_20 = arith.constant 0 : index
    %c0_21 = arith.constant 0 : index
    %68 = vector.load %arg4[%c0_20, %c0_21] : memref<64x128xbf16, #tpu.memory_space<vmem>>, vector<64x128xbf16>
    %cst_22 = arith.constant dense<0.000000e+00> : vector<16x128xf32>
    %69 = tpu.matmul %67, %68, %cst_22 {dimension_numbers = #tpu.dot_dimension_numbers<[1], [0], [0], [1], [0, 0, 1, 1], [], []>} : vector<16x64xbf16>, vector<64x128xbf16>, vector<16x128xf32> -> vector<16x128xf32>
    %70 = vector.broadcast %5 : vector<1x128xf32> to vector<16x128xf32>
    %71 = arith.addf %69, %70 : vector<16x128xf32>
    %72 = math.tanh %71 : vector<16x128xf32>
    %c0_23 = arith.constant 0 : index
    %c0_24 = arith.constant 0 : index
    %73 = vector.load %arg6[%c0_23, %c0_24] : memref<16x128xf32, #tpu.memory_space<vmem>>, vector<16x128xf32>
    tpu.vector_store %arg6[%c0_23, %c0_24], %72 {strides = array<i32>} : memref<16x128xf32, #tpu.memory_space<vmem>>, vector<16x128xf32>,
    return
  }
  func.func @transform_0(%arg0: i32) -> (i32, i32) {
    %c0_i32 = arith.constant 0 : i32
    %c0_i32_0 = arith.constant 0 : i32
    return %arg0, %c0_i32 : i32, i32
  }
  func.func @transform_1(%arg0: i32) -> (i32, i32) {
    %c0_i32 = arith.constant 0 : i32
    %c0_i32_0 = arith.constant 0 : i32
    %c0_i32_1 = arith.constant 0 : i32
    return %c0_i32, %c0_i32_0 : i32, i32
  }
  func.func @transform_2(%arg0: i32) -> (i32, i32) {
    %c0_i32 = arith.constant 0 : i32
    %c0_i32_0 = arith.constant 0 : i32
    %c0_i32_1 = arith.constant 0 : i32
    return %c0_i32, %c0_i32_0 : i32, i32
  }
  func.func @transform_3(%arg0: i32) -> (i32, i32) {
    %c0_i32 = arith.constant 0 : i32
    %c0_i32_0 = arith.constant 0 : i32
    %c0_i32_1 = arith.constant 0 : i32
    return %c0_i32, %c0_i32_0 : i32, i32
  }
  func.func @transform_4(%arg0: i32) -> (i32, i32) {
    %c0_i32 = arith.constant 0 : i32
    %c0_i32_0 = arith.constant 0 : i32
    %c0_i32_1 = arith.constant 0 : i32
    return %c0_i32, %c0_i32_0 : i32, i32
  }
  func.func @transform_5(%arg0: i32) -> (i32, i32) {
    %c0_i32 = arith.constant 0 : i32
    %c0_i32_0 = arith.constant 0 : i32
    return %arg0, %c0_i32 : i32, i32
  }
}

</mosaic_0001>

<bundles_post_ra>
// kernel: actor_forward.1
= control target key start
LH: loop header
LB: loop body
LE: loop exit
PB: predicated region body
PF: predicated region fallthrough
CT: control target
= control target key end

     0   :  { %vm40_vm0 = vcmask 1045504   ;;  %v467_v0 = vmov 0.0   ;;  %vm468_vm1 = vmmov 0   ;;  %vm36_vm2 = vcmask 97280   ;;  %s592_s1 = inlined_call_operand.vmem [shape: bf16[12,128], index: 1, kind: input, shape index: {}]   ;;  %s593_s0 = inlined_call_operand.vmem [shape: f32[16,12], index: 0, kind: input, shape index: {}]   ;;  %s594_s4 = inlined_call_operand.vmem [shape: f32[8,128], index: 4, kind: input, shape index: {}]   ;;  %s595_s2 = inlined_call_operand.vmem [shape: bf16[128,64], index: 2, kind: input, shape index: {}]   ;;  %s596_s3 = inlined_call_operand.vmem [shape: bf16[64,128], index: 3, kind: input, shape index: {}]   ;;  %s597_s5 = inlined_call_operand.vmem [shape: f32[16,128], index: 5, kind: output, shape index: {}]  }
   0x1   :  { %402 = vmatprep.subr.bf16.mxu0 %v467_v0  ;;  %v442_v1 = vld [vmem:[%s592_s1] sm:$0x3f]   ;;  %404 = vmatprep.mubr.msk.bf16.mxu0 %vm468_vm1, %v467_v0  ;;  %v22_v3 = vld [vmem:[%s593_s0 + $0x8] sm:$0xff]  ;;  %v27_v6 = vlaneseq  ;;  %v445_v21 = vld [vmem:[%s595_s2 + $0x10] sm:$0xff]   ;;  %vm236_vm3 = vcmask 523264  }
   0x2   :  { %v21_v2 = vld [vmem:[%s593_s0] sm:$0xff]  ;;  %408 = vmatprep.subr.bf16.mxu1 %v467_v0  ;;  %424 = vmatprep.mubr.msk.bf16.mxu1 %vm468_vm1, %v467_v0  ;;  %v42_v4 = vsel %vm40_vm0, %v442_v1, 0  ;;  %v444_v20 = vld [vmem:[%s595_s2 + $0x8] sm:$0xff]   ;;  %v446_v22 = vld [vmem:[%s595_s2 + $0x18] sm:$0xff]  }
   0x3   :  { %v24_v5 = vpack.c.bf16 %v22_v3, %v21_v2  ;;  %403 = vmatpush3.bf16.msra.mxu0 %v42_v4  ;;  %v514_v7 = vshrl.u32 %v27_v6, 7  ;;  %v520_v9 = vld [vmem:[%s594_s4] sm:$0xff]  ;;  %v448_v24 = vld [vmem:[%s595_s2 + $0x28] sm:$0xff]   ;;  %v449_v25 = vld [vmem:[%s595_s2 + $0x30] sm:$0xff]  }
   0x4   :  { %428 = vmatprep.subr.bf16.mxu0 %v467_v0  ;;  %v443_v19 = vld [vmem:[%s595_s2] sm:$0xff]   ;;  %v450_v26 = vld [vmem:[%s595_s2 + $0x38] sm:$0xff]  }
   0x5   :  { %v29_v8 = vsub.s32 0, %v514_v7  ;;  %409 = vmatpush3.bf16.msra.mxu1 %v443_v19  ;;  %v447_v23 = vld [vmem:[%s595_s2 + $0x20] sm:$0xff]   ;;  %v114_v41 = vsub.s32 1, %v514_v7  ;;  %v120_v44 = vsub.s32 2, %v514_v7  ;;  %v145_v58 = vsub.s32 4, %v514_v7 }
   0x6   :  { %405 = vmatmul.mubr.msk.bf16.vlgmr.msra.gmra.mrb[0].mxu0 %vm36_vm2, %v24_v5  ;;  %410 = vmatprep.subr.bf16.mxu1 %v467_v0 }
   0x7   :  { %436 = vmatprep.mubr.msk.bf16.mxu0 %vm468_vm1, %v467_v0  ;;  %v30_v10 = vrot.slane %v520_v9, %v29_v8  ;;  %v115_v43 = vrot.slane %v520_v9, %v114_v41  ;;  %v121_v49 = vrot.slane %v520_v9, %v120_v44  ;;  %v146_v59 = vrot.slane %v520_v9, %v145_v58 }
   0x9   :  { %411 = vmatpush3.bf16.msra.mxu1 %v444_v20 }
   0xa   :  { %412 = vmatprep.subr.bf16.mxu1 %v467_v0 }
   0xd   :  { %413 = vmatpush3.bf16.msra.mxu1 %v445_v21 }
   0xe   :  { %414 = vmatprep.subr.bf16.mxu1 %v467_v0 }
  0x11   :  { %415 = vmatpush3.bf16.msra.mxu1 %v446_v22 }
  0x12   :  { %416 = vmatprep.subr.bf16.mxu1 %v467_v0 }
  0x15   :  { %417 = vmatpush3.bf16.msra.mxu1 %v447_v23 }
  0x16   :  { %418 = vmatprep.subr.bf16.mxu1 %v467_v0 }
  0x19   :  { %419 = vmatpush3.bf16.msra.mxu1 %v448_v24 }
  0x1a   :  { %420 = vmatprep.subr.bf16.mxu1 %v467_v0 }
  0x1d   :  { %421 = vmatpush3.bf16.msra.mxu1 %v449_v25 }
  0x1e   :  { %422 = vmatprep.subr.bf16.mxu1 %v467_v0 }
  0x21   :  { %423 = vmatpush3.bf16.msra.mxu1 %v450_v26 }
  0xd9   :  { %v78_v11 = vpop.f32.mrb[0].mxu0 }
  0xda   :  { %v79_v12 = vadd.f32 %v78_v11, %v30_v10  ;;  %v406_v13 = vpop.f32.mrb[1].mxu0  ;;  %v451_v11 = vld [vmem:[%s596_s3] sm:$0xff]  }
  0xdb   :  { %v81_v14 = vpop.f32.mrb[2].mxu0  ;;  %429 = vmatpush3.bf16.msra.mxu0 %v451_v11  ;;  %v453_v13 = vld [vmem:[%s596_s3 + $0x10] sm:$0xff]  }
  0xdc   :  { %v82_v15 = vadd.f32 %v81_v14, %v30_v10  ;;  %85 = vadd.xlane.f32.xlu0 %v79_v12  ;;  %v407_v16 = vpop.f32.mrb[3].mxu0  ;;  %v92_v17 = vmul.f32 %v79_v12, %v79_v12  ;;  %430 = vmatprep.subr.bf16.mxu0 %v467_v0  ;;  %v454_v14 = vld [vmem:[%s596_s3 + $0x18] sm:$0xff]  }
  0xde   :  { %94 = vadd.xlane.f32.xlu1 %v92_v17  ;;  %v93_v18 = vmul.f32 %v82_v15, %v82_v15 }
  0xe0   :  { %87 = vadd.xlane.f32.xlu0 %v82_v15 }
  0xe2   :  { %96 = vadd.xlane.f32.xlu1 %v93_v18 }
 0x169   :  { %v86_v27 = vpop.xlane.xlu0 %85 }
 0x16a   :  { %v90_v28 = vmul.f32 0.0078125, %v86_v27 }
 0x16b   :  { %v95_v29 = vpop.xlane.xlu1 %94 }
 0x16c   :  { %v100_v30 = vmul.f32 %v90_v28, %v90_v28  ;;  %v98_v31 = vmul.f32 0.0078125, %v95_v29  ;;  %v104_v42 = vsub.f32 %v79_v12, %v90_v28  ;;  %v452_v12 = vld [vmem:[%s596_s3 + $0x8] sm:$0xff]   ;;  %v270_v29 = vsub.s32 5, %v514_v7 }
 0x16d   :  { %v88_v32 = vpop.xlane.xlu0 %87  ;;  %431 = vmatpush3.bf16.msra.mxu0 %v452_v12 }
 0x16e   :  { %v102_v33 = vsub.f32 %v98_v31, %v100_v30  ;;  %v91_v34 = vmul.f32 0.0078125, %v88_v32  ;;  %432 = vmatprep.subr.bf16.mxu0 %v467_v0  ;;  %v271_v31 = vrot.slane %v520_v9, %v270_v29 }
 0x16f   :  { %v97_v35 = vpop.xlane.xlu1 %96 }
 0x170   :  { %v106_v36 = vadd.f32 1e-05, %v102_v33  ;;  %v101_v37 = vmul.f32 %v91_v34, %v91_v34  ;;  %v99_v38 = vmul.f32 0.0078125, %v97_v35  ;;  %v105_v47 = vsub.f32 %v82_v15, %v91_v34 }
 0x171   :  { %433 = vmatpush3.bf16.msra.mxu0 %v453_v13 }
 0x172   :  { %455 = vrsqrt.f32 %v106_v36  ;;  %v103_v39 = vsub.f32 %v99_v38, %v101_v37  ;;  %434 = vmatprep.subr.bf16.mxu0 %v467_v0  ;;  %v276_v0 = vsub.s32 6, %v514_v7 }
 0x174   :  { %v107_v40 = vadd.f32 1e-05, %v103_v39  ;;  %v277_v35 = vrot.slane %v520_v9, %v276_v0 }
 0x175   :  { %435 = vmatpush3.bf16.msra.mxu0 %v454_v14 }
 0x176   :  { %457 = vrsqrt.f32 %v107_v40 }
 0x17c   :  { %v456_v45 = vpop.eup %455 }
 0x17d   :  { %v110_v46 = vmul.f32 %v456_v45, %v104_v42  ;;  %v293_v45 = vsub.s32 3, %v514_v7 }
 0x17f   :  { %v116_v48 = vmul.f32 %v115_v43, %v110_v46  ;;  %v294_v46 = vrot.slane %v520_v9, %v293_v45 }
 0x180   :  { %v458_v50 = vpop.eup %457 }
 0x181   :  { %v111_v51 = vmul.f32 %v458_v50, %v105_v47  ;;  %v122_v53 = vadd.f32 %v121_v49, %v116_v48 }
 0x183   :  { %v117_v52 = vmul.f32 %v115_v43, %v111_v51  ;;  %v124_v55 = vmax.f32 %v122_v53, 0.0 }
 0x185   :  { %v123_v54 = vadd.f32 %v121_v49, %v117_v52 }
 0x187   :  { %v125_v56 = vmax.f32 %v123_v54, 0.0 }
 0x189   :  { %v126_v57 = vpack.c.bf16 %v125_v56, %v124_v55 }
 0x18b   :  { %425 = vmatmul.mubr.bf16.vlgmr.msra.gmra.mrb[0].mxu1 %v126_v57 }
 0x25e   :  { %v229_v60 = vpop.f32.mrb[0].mxu1 }
 0x25f   :  { %v230_v61 = vadd.f32 %v229_v60, %v146_v59  ;;  %v426_v62 = vpop.f32.mrb[1].mxu1 }
 0x260   :  { %v232_v63 = vpop.f32.mrb[2].mxu1 }
 0x261   :  { %v233_v1 = vadd.f32 %v232_v63, %v146_v59  ;;  %v427_v2 = vpop.f32.mrb[3].mxu1  ;;  %v237_v3 = vsel %vm236_vm3, %v230_v61, 0.0  ;;  %v246_v4 = vmul.f32 %v230_v61, %v230_v61 }
 0x262   :  { %238 = vadd.xlane.f32.xlu0 %v237_v3 }
 0x263   :  { %v240_v5 = vsel %vm236_vm3, %v233_v1, 0.0  ;;  %v247_v6 = vmul.f32 %v233_v1, %v233_v1  ;;  %v248_v8 = vsel %vm236_vm3, %v246_v4, 0.0 }
 0x264   :  { %241 = vadd.xlane.f32.xlu1 %v240_v5 }
 0x265   :  { %v251_v10 = vsel %vm236_vm3, %v247_v6, 0.0 }
 0x266   :  { %249 = vadd.xlane.f32.xlu0 %v248_v8 }
 0x268   :  { %252 = vadd.xlane.f32.xlu1 %v251_v10 }
 0x2ef   :  { %v239_v15 = vpop.xlane.xlu0 %238 }
 0x2f0   :  { %v244_v16 = vmul.f32 0.015625, %v239_v15 }
 0x2f1   :  { %v242_v17 = vpop.xlane.xlu1 %241 }
 0x2f2   :  { %v245_v18 = vmul.f32 0.015625, %v242_v17  ;;  %v256_v20 = vmul.f32 %v244_v16, %v244_v16  ;;  %v260_v30 = vsub.f32 %v230_v61, %v244_v16 }
 0x2f3   :  { %v250_v19 = vpop.xlane.xlu0 %249 }
 0x2f4   :  { %v254_v21 = vmul.f32 0.015625, %v250_v19  ;;  %v257_v23 = vmul.f32 %v245_v18, %v245_v18  ;;  %v261_v33 = vsub.f32 %v233_v1, %v245_v18 }
 0x2f5   :  { %v253_v22 = vpop.xlane.xlu1 %252 }
 0x2f6   :  { %v258_v24 = vsub.f32 %v254_v21, %v256_v20  ;;  %v255_v25 = vmul.f32 0.015625, %v253_v22 }
 0x2f8   :  { %v262_v26 = vadd.f32 1e-05, %v258_v24  ;;  %v259_v27 = vsub.f32 %v255_v25, %v257_v23 }
 0x2fa   :  { %459 = vrsqrt.f32 %v262_v26  ;;  %v263_v28 = vadd.f32 1e-05, %v259_v27 }
 0x2fc   :  { %461 = vrsqrt.f32 %v263_v28 }
 0x304   :  { %v460_v32 = vpop.eup %459 }
 0x305   :  { %v266_v34 = vmul.f32 %v460_v32, %v260_v30 }
 0x306   :  { %v462_v36 = vpop.eup %461 }
 0x307   :  { %v272_v37 = vmul.f32 %v271_v31, %v266_v34  ;;  %v267_v38 = vmul.f32 %v462_v36, %v261_v33 }
 0x309   :  { %v273_v39 = vmul.f32 %v271_v31, %v267_v38  ;;  %v278_v40 = vadd.f32 %v277_v35, %v272_v37 }
 0x30b   :  { %v279_v41 = vadd.f32 %v277_v35, %v273_v39  ;;  %v280_v42 = vmax.f32 %v278_v40, 0.0 }
 0x30d   :  { %v281_v43 = vmax.f32 %v279_v41, 0.0 }
 0x30f   :  { %v282_v44 = vpack.c.bf16 %v281_v43, %v280_v42 }
 0x311   :  { %437 = vmatmul.mubr.msk.bf16.vlgmr.msra.gmra.mrb[4].mxu0 %vm236_vm3, %v282_v44 }
 0x3e4   :  { %v356_v47 = vpop.f32.mrb[4].mxu0 }
 0x3e5   :  { %v357_v48 = vadd.f32 %v356_v47, %v294_v46  ;;  %v438_v49 = vpop.f32.mrb[5].mxu0 }
 0x3e6   :  { %v359_v50 = vpop.f32.mrb[6].mxu0 }
 0x3e7   :  { %463 = vtanh.f32 %v357_v48  ;;  %v360_v51 = vadd.f32 %v359_v50, %v294_v46  ;;  %v439_v52 = vpop.f32.mrb[7].mxu0 }
 0x3e9   :  { %465 = vtanh.f32 %v360_v51 }
 0x3f1   :  { %v464_v53 = vpop.eup %463 }
 0x3f2   :  { %365 = vst [vmem:[%s597_s5] sm:$0xff] %v464_v53 }
 0x3f3   :  { %v466_v54 = vpop.eup %465 }
 0x3f4   :  { %366 = vst [vmem:[%s597_s5 + $0x8] sm:$0xff] %v466_v54 }

</bundles_post_ra>
